<compile_context>
chip_gen: v6e
topology: v6e:2x2x1
jax: 0.10.0
libtpu: 0.0.40
codegen_flags: <defaults>
</compile_context>

<pallas_src>
import functools

import jax
import jax.numpy as jnp
from jax.experimental import pallas as pl
from jax.experimental.pallas import tpu as pltpu


def actor_kernel(x_ref, w1_ref, b1_ref, w2_ref, b2_ref, w3_ref, b3_ref,
                 mean_ref):
    x = x_ref[...]                                   # (TILE_B, obs_dim) bf16

    # Layer 1: Linear + ReLU (bf16 MXU matmul, f32 accumulate)
    h1 = jnp.dot(x, w1_ref[...], preferred_element_type=jnp.float32) + b1_ref[...]
    h1 = jnp.maximum(h1, 0.0)

    # Layer 2: Linear + ReLU
    h2 = jnp.dot(h1.astype(w2_ref.dtype), w2_ref[...],
                 preferred_element_type=jnp.float32) + b2_ref[...]
    h2 = jnp.maximum(h2, 0.0)

    # Mean head: Linear + tanh (output stays un-padded: A lanes)
    m = jnp.dot(h2.astype(w3_ref.dtype), w3_ref[...],
                preferred_element_type=jnp.float32) + b3_ref[...]
    mean_ref[...] = jnp.tanh(m).astype(mean_ref.dtype)


def _choose_tile_b(batch, max_tile=2048):
    """Power-of-two batch tile, >= 2 grid steps for large batches (v7x cores)."""
    target = max(8, -(-batch // 2))          # cdiv(batch, 2), floor 8
    tile = 8
    while tile * 2 <= min(target, max_tile):
        tile *= 2
    return tile


@functools.partial(jax.jit, static_argnames=("tile_b",))
def _actor_forward_impl(x, w1, b1, w2, b2, w3, b3, log_std, *, tile_b):
    B, obs_dim = x.shape
    H1 = w1.shape[1]
    H2 = w2.shape[1]
    A = w3.shape[1]

    x = x.astype(w1.dtype)                   # bf16 operand for the MXU
    num_tiles = pl.cdiv(B, tile_b)           # ragged last tile handled by Pallas

    mean = pl.pallas_call(
        actor_kernel,
        out_shape=jax.ShapeDtypeStruct((B, A), jnp.float32),
        grid=(num_tiles,),
        in_specs=[
            pl.BlockSpec((tile_b, obs_dim), lambda i: (i, 0)),   # x tile
            pl.BlockSpec((obs_dim, H1), lambda i: (0, 0)),       # W1 (resident)
            pl.BlockSpec((1, H1), lambda i: (0, 0)),             # b1
            pl.BlockSpec((H1, H2), lambda i: (0, 0)),            # W2
            pl.BlockSpec((1, H2), lambda i: (0, 0)),             # b2
            pl.BlockSpec((H2, A), lambda i: (0, 0)),             # W3
            pl.BlockSpec((1, A), lambda i: (0, 0)),              # b3
        ],
        out_specs=pl.BlockSpec((tile_b, A), lambda i: (i, 0)),
        compiler_params=pltpu.CompilerParams(
            dimension_semantics=("parallel",),
        ),
    )(x, w1, b1, w2, b2, w3, b3)

    # std is batch-independent: compute once in the wrapper and broadcast.
    std = jnp.broadcast_to(jnp.exp(jnp.clip(log_std, -20.0, 2.0)), (B, A))
    return mean, std


def actor_forward(x, w1, b1, w2, b2, w3, b3, log_std):
    tile_b = _choose_tile_b(x.shape[0])
    return _actor_forward_impl(x, w1, b1, w2, b2, w3, b3, log_std,
                               tile_b=tile_b)


def init_params(key, obs_dim, action_dim, hidden_1=128, hidden_2=128):
    """Deterministic synthetic parameters (not a checkpoint load).

    Weights are stored as bf16 once at init (matmul operands); biases and
    log_std stay f32 (elementwise math / accumulation stays f32).
    """
    k1, k2, k3, k4, k5, k6 = jax.random.split(key, 6)
    scale = 0.1
    w1 = (scale * jax.random.normal(k1, (obs_dim, hidden_1), jnp.float32)).astype(jnp.bfloat16)
    b1 = scale * jax.random.normal(k2, (1, hidden_1), jnp.float32)
    w2 = (scale * jax.random.normal(k3, (hidden_1, hidden_2), jnp.float32)).astype(jnp.bfloat16)
    b2 = scale * jax.random.normal(k4, (1, hidden_2), jnp.float32)
    w3 = (scale * jax.random.normal(k5, (hidden_2, action_dim), jnp.float32)).astype(jnp.bfloat16)
    b3 = scale * jax.random.normal(k6, (1, action_dim), jnp.float32)
    log_std = jnp.zeros((1, action_dim), jnp.float32)  # nn.Parameter(torch.zeros(1, A))
    return w1, b1, w2, b2, w3, b3, log_std


def reference_forward(x, w1, b1, w2, b2, w3, b3, log_std):
    """Plain-JAX reference with the same bf16-operand / f32-accumulate math."""
    xb = x.astype(w1.dtype)
    h1 = jnp.maximum(jnp.dot(xb, w1, preferred_element_type=jnp.float32) + b1, 0.0)
    h2 = jnp.maximum(
        jnp.dot(h1.astype(w2.dtype), w2, preferred_element_type=jnp.float32) + b2, 0.0)
    mean = jnp.tanh(
        jnp.dot(h2.astype(w3.dtype), w3, preferred_element_type=jnp.float32) + b3)
    std = jnp.broadcast_to(jnp.exp(jnp.clip(log_std, -20.0, 2.0)), mean.shape)
    return mean, std


if __name__ == "__main__":
    key = jax.random.PRNGKey(0)
    kx, kp = jax.random.split(key)

    batch = 8
    obs_dim = 32
    action_dim = 8
    hidden_1 = 128
    hidden_2 = 128

    x = jax.random.normal(kx, (batch, obs_dim), jnp.float32)
    params = init_params(kp, obs_dim, action_dim, hidden_1, hidden_2)

    mean, std = actor_forward(x, *params)
    jax.block_until_ready((mean, std))

    # Reference check: same bf16-operand math in plain JAX.
    mean_ref, std_ref = reference_forward(x, *params)
    assert mean.shape == (batch, action_dim) and std.shape == (batch, action_dim)
    assert jnp.allclose(mean, mean_ref, atol=1e-3), "mean mismatch"
    assert jnp.allclose(std, std_ref, atol=1e-6), "std mismatch"

    # Fidelity to the full-f32 PyTorch math (bf16 operand rounding only).
    w1, b1, w2, b2, w3, b3, log_std = params
    h1f = jnp.maximum(x @ w1.astype(jnp.float32) + b1, 0.0)
    h2f = jnp.maximum(h1f @ w2.astype(jnp.float32) + b2, 0.0)
    mean_f32 = jnp.tanh(h2f @ w3.astype(jnp.float32) + b3)
    assert jnp.allclose(mean, mean_f32, atol=3e-2), "f32-fidelity mismatch"

    # Exercise a larger, non-tile-multiple batch to check the ragged-grid path.
    big_x = jax.random.normal(kx, (1000, obs_dim), jnp.float32)
    big_mean, big_std = actor_forward(big_x, *params)
    jax.block_until_ready((big_mean, big_std))
    big_mean_ref, big_std_ref = reference_forward(big_x, *params)
    assert big_mean.shape == (1000, action_dim) and big_std.shape == (1000, action_dim)
    assert jnp.allclose(big_mean, big_mean_ref, atol=1e-3), "big mean mismatch"
    assert jnp.allclose(big_std, big_std_ref, atol=1e-6), "big std mismatch"

    print("KERNEL_OK")
</pallas_src>

<mosaic_0001>
module attributes {stable_mosaic.version = 11 : i64} {
  func.func @actor_kernel(%arg0: i32, %arg1: memref<8x32xbf16, #tpu.memory_space<vmem>>, %arg2: memref<32x128xbf16, #tpu.memory_space<vmem>>, %arg3: memref<1x128xf32, #tpu.memory_space<vmem>>, %arg4: memref<128x128xbf16, #tpu.memory_space<vmem>>, %arg5: memref<1x128xf32, #tpu.memory_space<vmem>>, %arg6: memref<128x8xbf16, #tpu.memory_space<vmem>>, %arg7: memref<1x8xf32, #tpu.memory_space<vmem>>, %arg8: memref<8x8xf32, #tpu.memory_space<vmem>>) attributes {dimension_semantics = [#tpu.dimension_semantics<parallel>], iteration_bounds = array<i64: 1>, scalar_prefetch = 0 : i64, scratch_operands = 0 : i64, tpu.core_type = #tpu.core_type<tc>, window_params = [{transform_indices = @transform_0, window_bounds = array<i64: 8, 32>}, {pipeline_mode = #tpu.pipeline_mode<synchronous>, transform_indices = @transform_1, window_bounds = array<i64: 32, 128>}, {pipeline_mode = #tpu.pipeline_mode<synchronous>, transform_indices = @transform_2, window_bounds = array<i64: 1, 128>}, {pipeline_mode = #tpu.pipeline_mode<synchronous>, transform_indices = @transform_3, window_bounds = array<i64: 128, 128>}, {pipeline_mode = #tpu.pipeline_mode<synchronous>, transform_indices = @transform_4, window_bounds = array<i64: 1, 128>}, {pipeline_mode = #tpu.pipeline_mode<synchronous>, transform_indices = @transform_5, window_bounds = array<i64: 128, 8>}, {pipeline_mode = #tpu.pipeline_mode<synchronous>, transform_indices = @transform_6, window_bounds = array<i64: 1, 8>}, {transform_indices = @transform_7, window_bounds = array<i64: 8, 8>}]} {
    %c0 = arith.constant 0 : index
    %c0_0 = arith.constant 0 : index
    %0 = vector.load %arg1[%c0, %c0_0] : memref<8x32xbf16, #tpu.memory_space<vmem>>, vector<8x32xbf16>
    %c0_1 = arith.constant 0 : index
    %c0_2 = arith.constant 0 : index
    %1 = vector.load %arg2[%c0_1, %c0_2] : memref<32x128xbf16, #tpu.memory_space<vmem>>, vector<32x128xbf16>
    %cst = arith.constant dense<0.000000e+00> : vector<8x128xf32>
    %2 = tpu.matmul %0, %1, %cst {dimension_numbers = #tpu.dot_dimension_numbers<[1], [0], [0], [1], [0, 0, 1, 1], [], []>} : vector<8x32xbf16>, vector<32x128xbf16>, vector<8x128xf32> -> vector<8x128xf32>
    %c0_3 = arith.constant 0 : index
    %c0_4 = arith.constant 0 : index
    %3 = vector.load %arg3[%c0_3, %c0_4] : memref<1x128xf32, #tpu.memory_space<vmem>>, vector<1x128xf32>
    %4 = vector.broadcast %3 : vector<1x128xf32> to vector<8x128xf32>
    %5 = arith.addf %2, %4 : vector<8x128xf32>
    %cst_5 = arith.constant 0.000000e+00 : f32
    %6 = vector.broadcast %cst_5 : f32 to vector<8x128xf32>
    %7 = arith.maximumf %5, %6 : vector<8x128xf32>
    %8 = arith.truncf %7 : vector<8x128xf32> to vector<8x128xbf16>
    %c0_6 = arith.constant 0 : index
    %c0_7 = arith.constant 0 : index
    %9 = vector.load %arg4[%c0_6, %c0_7] : memref<128x128xbf16, #tpu.memory_space<vmem>>, vector<128x128xbf16>
    %cst_8 = arith.constant dense<0.000000e+00> : vector<8x128xf32>
    %10 = tpu.matmul %8, %9, %cst_8 {dimension_numbers = #tpu.dot_dimension_numbers<[1], [0], [0], [1], [0, 0, 1, 1], [], []>} : vector<8x128xbf16>, vector<128x128xbf16>, vector<8x128xf32> -> vector<8x128xf32>
    %c0_9 = arith.constant 0 : index
    %c0_10 = arith.constant 0 : index
    %11 = vector.load %arg5[%c0_9, %c0_10] : memref<1x128xf32, #tpu.memory_space<vmem>>, vector<1x128xf32>
    %12 = vector.broadcast %11 : vector<1x128xf32> to vector<8x128xf32>
    %13 = arith.addf %10, %12 : vector<8x128xf32>
    %cst_11 = arith.constant 0.000000e+00 : f32
    %14 = vector.broadcast %cst_11 : f32 to vector<8x128xf32>
    %15 = arith.maximumf %13, %14 : vector<8x128xf32>
    %16 = arith.truncf %15 : vector<8x128xf32> to vector<8x128xbf16>
    %c0_12 = arith.constant 0 : index
    %c0_13 = arith.constant 0 : index
    %17 = vector.load %arg6[%c0_12, %c0_13] : memref<128x8xbf16, #tpu.memory_space<vmem>>, vector<128x8xbf16>
    %cst_14 = arith.constant dense<0.000000e+00> : vector<8x8xf32>
    %18 = tpu.matmul %16, %17, %cst_14 {dimension_numbers = #tpu.dot_dimension_numbers<[1], [0], [0], [1], [0, 0, 1, 1], [], []>} : vector<8x128xbf16>, vector<128x8xbf16>, vector<8x8xf32> -> vector<8x8xf32>
    %c0_15 = arith.constant 0 : index
    %c0_16 = arith.constant 0 : index
    %19 = vector.load %arg7[%c0_15, %c0_16] : memref<1x8xf32, #tpu.memory_space<vmem>>, vector<1x8xf32>
    %20 = vector.broadcast %19 : vector<1x8xf32> to vector<8x8xf32>
    %21 = arith.addf %18, %20 : vector<8x8xf32>
    %22 = math.tanh %21 : vector<8x8xf32>
    %c0_17 = arith.constant 0 : index
    %c0_18 = arith.constant 0 : index
    %23 = vector.load %arg8[%c0_17, %c0_18] : memref<8x8xf32, #tpu.memory_space<vmem>>, vector<8x8xf32>
    tpu.vector_store %arg8[%c0_17, %c0_18], %22 {strides = array<i32>} : memref<8x8xf32, #tpu.memory_space<vmem>>, vector<8x8xf32>,
    return
  }
  func.func @transform_0(%arg0: i32) -> (i32, i32) {
    %c0_i32 = arith.constant 0 : i32
    %c0_i32_0 = arith.constant 0 : i32
    return %arg0, %c0_i32 : i32, i32
  }
  func.func @transform_1(%arg0: i32) -> (i32, i32) {
    %c0_i32 = arith.constant 0 : i32
    %c0_i32_0 = arith.constant 0 : i32
    %c0_i32_1 = arith.constant 0 : i32
    return %c0_i32, %c0_i32_0 : i32, i32
  }
  func.func @transform_2(%arg0: i32) -> (i32, i32) {
    %c0_i32 = arith.constant 0 : i32
    %c0_i32_0 = arith.constant 0 : i32
    %c0_i32_1 = arith.constant 0 : i32
    return %c0_i32, %c0_i32_0 : i32, i32
  }
  func.func @transform_3(%arg0: i32) -> (i32, i32) {
    %c0_i32 = arith.constant 0 : i32
    %c0_i32_0 = arith.constant 0 : i32
    %c0_i32_1 = arith.constant 0 : i32
    return %c0_i32, %c0_i32_0 : i32, i32
  }
  func.func @transform_4(%arg0: i32) -> (i32, i32) {
    %c0_i32 = arith.constant 0 : i32
    %c0_i32_0 = arith.constant 0 : i32
    %c0_i32_1 = arith.constant 0 : i32
    return %c0_i32, %c0_i32_0 : i32, i32
  }
  func.func @transform_5(%arg0: i32) -> (i32, i32) {
    %c0_i32 = arith.constant 0 : i32
    %c0_i32_0 = arith.constant 0 : i32
    %c0_i32_1 = arith.constant 0 : i32
    return %c0_i32, %c0_i32_0 : i32, i32
  }
  func.func @transform_6(%arg0: i32) -> (i32, i32) {
    %c0_i32 = arith.constant 0 : i32
    %c0_i32_0 = arith.constant 0 : i32
    %c0_i32_1 = arith.constant 0 : i32
    return %c0_i32, %c0_i32_0 : i32, i32
  }
  func.func @transform_7(%arg0: i32) -> (i32, i32) {
    %c0_i32 = arith.constant 0 : i32
    %c0_i32_0 = arith.constant 0 : i32
    return %arg0, %c0_i32 : i32, i32
  }
}

</mosaic_0001>

<bundles_post_ra>
// kernel: _actor_forward_impl.1
= control target key start
LH: loop header
LB: loop body
LE: loop exit
PB: predicated region body
PF: predicated region fallthrough
CT: control target
= control target key end

     0   :  { %12 = vsyncpa [#allocation3], 0  ;;  %s718_s0 = inlined_call_operand.vmem [shape: bf16[8,32], index: 0, kind: input, shape index: {}]   ;;  %s719_s1 = inlined_call_operand.vmem [shape: bf16[32,128], index: 1, kind: input, shape index: {}]   ;;  %s720_s2 = inlined_call_operand.hbm [shape: f32[1,128], index: 2, kind: input, shape index: {}]   ;;  %s721_s3 = inlined_call_operand.vmem [shape: bf16[128,128], index: 3, kind: input, shape index: {}]   ;;  %s722_s4 = inlined_call_operand.hbm [shape: f32[1,128], index: 4, kind: input, shape index: {}]   ;;  %s723_s5 = inlined_call_operand.vmem [shape: bf16[128,8], index: 5, kind: input, shape index: {}]   ;;  %s724_s6 = inlined_call_operand.hbm [shape: f32[1,8], index: 6, kind: input, shape index: {}]   ;;  %s725_s7 = inlined_call_operand.hbm [shape: f32[8,8], index: 7, kind: output, shape index: {}]  }
   0x1   :  { %13 = vsyncpa [#allocation6], 0 }
   0x2   :  { %14 = vsyncpa [#allocation4], 0  ;;  %s579_s24 = smov [#allocation5]   ;;  %s580_s26 = smov [#allocation2]  }
   0x3   :  { %s37_s25 = sshll.u32 %s579_s24, 4  ;;  %s25_s27 = sshll.u32 %s580_s26, 4  ;;  %s38_s25 = int_to_ptr.vmem [resolvable:$true] %s37_s25  ;;  %s26_s27 = int_to_ptr.vmem [resolvable:$true] %s25_s27 }
   0x4   :  { %s501_s28 = scalar_lea.vmem %s38_s25, 16  ;;  %s505_s29 = scalar_lea.vmem %s38_s25, 32 }
   0x5   :  { %p502_p0 = scmp.ne.s32.totalorder %s38_s25, %s501_s28  ;;  %p506_p1 = scmp.lt.s32.totalorder %s38_s25, %s38_s25 }
   0x6   :  { %p507_p2 = scmp.lt.s32.totalorder %s505_s29, %s501_s28 }
   0x8   :  { %p508_p3 = por %p507_p2, %p506_p1 }
   0xa   :  { %p509_p4 = pnand %p508_p3, %p502_p0 }
   0xc   :  { %512 = shalt.err (!%p509_p4)
}
   0xd   :  { %40 = dma.hbm_to_vmem [thread:$0]  %s722_s4, 16, %s38_s25, [#allocation6]  }
   0xe   :  { %s521_s9 = scalar_lea.vmem %s26_s27, 16  ;;  %s525_s10 = scalar_lea.vmem %s26_s27, 32 }
   0xf   :  { %p522_p5 = scmp.ne.s32.totalorder %s26_s27, %s521_s9  ;;  %p526_p6 = scmp.lt.s32.totalorder %s26_s27, %s26_s27 }
  0x10   :  { %p527_p7 = scmp.lt.s32.totalorder %s525_s10, %s521_s9 }
  0x12   :  { %p528_p8 = por %p527_p7, %p526_p6 }
  0x14   :  { %p529_p9 = pnand %p528_p8, %p522_p5 }
  0x16   :  { %532 = shalt.err (!%p529_p9)
}
  0x17   :  { %28 = dma.hbm_to_vmem [thread:$0]  %s720_s2, 16, %s26_s27, [#allocation3]  }
  0x18   :  { %s581_s13 = smov [#allocation7]  }
  0x19   :  { %s49_s14 = sshll.u32 %s581_s13, 4  ;;  %s50_s14 = int_to_ptr.vmem [resolvable:$true] %s49_s14 }
  0x1a   :  { %s541_s15 = scalar_lea.vmem %s50_s14, 16  ;;  %s545_s16 = scalar_lea.vmem %s50_s14, 32 }
  0x1b   :  { %p542_p10 = scmp.ne.s32.totalorder %s50_s14, %s541_s15  ;;  %p546_p11 = scmp.lt.s32.totalorder %s50_s14, %s50_s14 }
  0x1c   :  { %p547_p12 = scmp.lt.s32.totalorder %s545_s16, %s541_s15 }
  0x1e   :  { %p548_p13 = por %p547_p12, %p546_p11 }
  0x20   :  { %p549_p0 = pnand %p548_p13, %p542_p10 }
  0x22   :  { %552 = shalt.err (!%p549_p0)
}
  0x23   :  { %52 = dma.hbm_to_vmem [thread:$0]  %s724_s6, 16, %s50_s14, [#allocation6]  }
  0x24   :  { %573 = dma.done.wait [#allocation3], 16  }
  0x25   :  { %574 = vsyncadd [#allocation3], 4294967280 }
  0x26   :  { %575 = dma.done.wait [#allocation6], 32  }
  0x27   :  { %576 = vsyncadd [#allocation6], 4294967264  ;;  %v582_v0 = vmov 0.0   ;;  %vm583_vm0 = vmmov 0   ;;  %v473_v1 = vld [vmem:[%s719_s1 + $0x8] sm:$0xff]   ;;  %v474_v2 = vld [vmem:[%s719_s1] sm:$0xff]  }
  0x28   :  { %419 = vmatprep.subr.bf16.mxu0 %v582_v0  ;;  %423 = vmatprep.mubr.msk.bf16.mxu0 %vm583_vm0, %v582_v0  ;;  %v475_v3 = vld [vmem:[%s721_s3 + $0x38] sm:$0xff]   ;;  %vm87_vm1 = vcmask 261120   ;;  %v476_v4 = vld [vmem:[%s721_s3 + $0x30] sm:$0xff]   ;;  %v63_v5 = vld [vmem:[%s718_s0] sm:$0xf]  ;;  %s584_s25 = smov [#allocation8]  }
  0x29   :  { %427 = vmatprep.subr.bf16.mxu1 %v582_v0  ;;  %443 = vmatprep.mubr.msk.bf16.mxu1 %vm583_vm0, %v582_v0  ;;  %v477_v6 = vld [vmem:[%s721_s3 + $0x28] sm:$0xff]   ;;  %v478_v7 = vld [vmem:[%s721_s3 + $0x20] sm:$0xff]   ;;  %v479_v8 = vld [vmem:[%s721_s3 + $0x18] sm:$0xff]   ;;  %s366_s1 = sshll.u32 %s584_s25, 4  ;;  %vm358_vm2 = vcmask 64512   ;;  %s367_s1 = int_to_ptr.vmem [resolvable:$true] %s366_s1 }
  0x2a   :  { %420 = vmatpush3.bf16.msra.mxu0 %v473_v1  ;;  %428 = vmatpush3.bf16.msra.mxu1 %v475_v3  ;;  %v480_v9 = vld [vmem:[%s721_s3 + $0x10] sm:$0xff]   ;;  %v481_v10 = vld [vmem:[%s721_s3 + $0x8] sm:$0xff]   ;;  %v482_v11 = vld [vmem:[%s721_s3] sm:$0xff]   ;;  %p558_p2 = scmp.lt.s32.totalorder %s367_s1, %s367_s1 }
  0x2b   :  { %421 = vmatprep.subr.bf16.mxu0 %v582_v0  ;;  %429 = vmatprep.subr.bf16.mxu1 %v582_v0  ;;  %v483_v12 = vld [vmem:[%s723_s5 + $0x38] sm:$0xff]   ;;  %v484_v13 = vld [vmem:[%s723_s5 + $0x30] sm:$0xff]   ;;  %v485_v14 = vld [vmem:[%s723_s5 + $0x28] sm:$0xff]  }
  0x2c   :  { %v486_v15 = vld [vmem:[%s723_s5 + $0x20] sm:$0xff]   ;;  %v487_v16 = vld [vmem:[%s723_s5 + $0x18] sm:$0xff]   ;;  %v488_v17 = vld [vmem:[%s723_s5 + $0x10] sm:$0xff]  }
  0x2d   :  { %v376_v18 = vld [vmem:[#allocation2] ss:$0 sm:$0xff]  ;;  %v489_v26 = vld [vmem:[%s723_s5 + $0x8] sm:$0xff]   ;;  %v380_v28 = vld [vmem:[#allocation5] ss:$0 sm:$0xff] }
  0x2e   :  { %422 = vmatpush3.bf16.msra.mxu0 %v474_v2  ;;  %430 = vmatpush3.bf16.msra.mxu1 %v476_v4  ;;  %v490_v27 = vld [vmem:[%s723_s5] sm:$0xff]   ;;  %s553_s5 = scalar_lea.vmem %s367_s1, 128 }
  0x2f   :  { %447 = vmatprep.subr.bf16.mxu0 %v582_v0  ;;  %431 = vmatprep.subr.bf16.mxu1 %v582_v0  ;;  %v389_v36 = vld [vmem:[#allocation7] ss:$0 sm:$0xff]  ;;  %p554_p1 = scmp.ne.s32.totalorder %s367_s1, %s553_s5  ;;  %p559_p3 = scmp.lt.s32.totalorder %s553_s5, %s553_s5 }
  0x31   :  { %424 = vmatmul.mubr.msk.bf16.vlgmr.msra.gmra.mxu0 %vm87_vm1, %v63_v5  ;;  %p560_p4 = por %p559_p3, %p558_p2 }
  0x32   :  { %463 = vmatprep.mubr.msk.bf16.mxu0 %vm583_vm0, %v582_v0  ;;  %432 = vmatpush3.bf16.msra.mxu1 %v477_v6 }
  0x33   :  { %433 = vmatprep.subr.bf16.mxu1 %v582_v0  ;;  %448 = vmatpush3.bf16.msra.mxu0 %v483_v12  ;;  %p561_p5 = pnand %p560_p4, %p554_p1 }
  0x34   :  { %449 = vmatprep.subr.bf16.mxu0 %v582_v0 }
  0x36   :  { %434 = vmatpush3.bf16.msra.mxu1 %v478_v7 }
  0x37   :  { %435 = vmatprep.subr.bf16.mxu1 %v582_v0  ;;  %450 = vmatpush3.bf16.msra.mxu0 %v484_v13 }
  0x38   :  { %451 = vmatprep.subr.bf16.mxu0 %v582_v0 }
  0x3a   :  { %436 = vmatpush3.bf16.msra.mxu1 %v479_v8 }
  0x3b   :  { %437 = vmatprep.subr.bf16.mxu1 %v582_v0  ;;  %452 = vmatpush3.bf16.msra.mxu0 %v485_v14 }
  0x3c   :  { %453 = vmatprep.subr.bf16.mxu0 %v582_v0 }
  0x3e   :  { %438 = vmatpush3.bf16.msra.mxu1 %v480_v9 }
  0x3f   :  { %439 = vmatprep.subr.bf16.mxu1 %v582_v0  ;;  %454 = vmatpush3.bf16.msra.mxu0 %v486_v15 }
  0x40   :  { %455 = vmatprep.subr.bf16.mxu0 %v582_v0 }
  0x42   :  { %440 = vmatpush3.bf16.msra.mxu1 %v481_v10 }
  0x43   :  { %441 = vmatprep.subr.bf16.mxu1 %v582_v0  ;;  %456 = vmatpush3.bf16.msra.mxu0 %v487_v16 }
  0x44   :  { %457 = vmatprep.subr.bf16.mxu0 %v582_v0 }
  0x46   :  { %442 = vmatpush3.bf16.msra.mxu1 %v482_v11 }
  0x47   :  { %458 = vmatpush3.bf16.msra.mxu0 %v488_v17 }
  0x48   :  { %459 = vmatprep.subr.bf16.mxu0 %v582_v0 }
  0x4b   :  { %460 = vmatpush3.bf16.msra.mxu0 %v489_v26 }
  0x4c   :  { %461 = vmatprep.subr.bf16.mxu0 %v582_v0 }
  0x4f   :  { %462 = vmatpush3.bf16.msra.mxu0 %v490_v27 }
  0xf1   :  { %v125_v19 = vpop.f32.mrf.mxu0 }
  0xf2   :  { %v126_v20 = vadd.f32 %v376_v18, %v125_v19 }
  0xf3   :  { %v425_v21 = vpop.f32.mrf.mxu0 }
  0xf4   :  { %v131_v22 = vmax.f32 %v126_v20, 0.0 }
  0xf5   :  { %v128_v23 = vpop.f32.mrf.mxu0 }
  0xf6   :  { %v132_v24 = vpack.c.bf16 %v131_v22, %v131_v22 }
  0xf7   :  { %v426_v25 = vpop.f32.mrf.mxu0 }
  0xf8   :  { %444 = vmatmul.mubr.bf16.vlgmr.msra.gmra.mxu1 %v132_v24 }
 0x1b8   :  { %v238_v29 = vpop.f32.mrf.mxu1 }
 0x1b9   :  { %v239_v30 = vadd.f32 %v380_v28, %v238_v29 }
 0x1ba   :  { %v445_v31 = vpop.f32.mrf.mxu1 }
 0x1bb   :  { %v244_v32 = vmax.f32 %v239_v30, 0.0 }
 0x1bc   :  { %v241_v33 = vpop.f32.mrf.mxu1 }
 0x1bd   :  { %v245_v34 = vpack.c.bf16 %v244_v32, %v244_v32 }
 0x1be   :  { %v446_v35 = vpop.f32.mrf.mxu1 }
 0x1bf   :  { %464 = vmatmul.mubr.bf16.vlgmr.msra.gmra.mxu0 %v245_v34 }
 0x27f   :  { %v351_v37 = vpop.f32.mrf.mxu0 }
 0x280   :  { %v352_v38 = vadd.f32 %v389_v36, %v351_v37 }
 0x281   :  { %v465_v39 = vpop.f32.mrf.mxu0 }
 0x282   :  { %491 = vtanh.f32 %v352_v38 }
 0x283   :  { %v354_v40 = vpop.f32.mrf.mxu0 }
 0x285   :  { %v466_v41 = vpop.f32.mrf.mxu0 }
 0x28f   :  { %v492_v42 = vpop.eup %491 }
 0x290   :  { %359 = vst.msk [vmem:[#allocation8] sm:$0xff] %vm358_vm2, %v492_v42 }
 0x291   :  { %564 = shalt.err (!%p561_p5)
}
 0x292   :  { %369 = dma.vmem_to_hbm [thread:$0]  %s367_s1, 128, %s725_s7, [#allocation4]  }
 0x293   :  { %577 = dma.done.wait [#allocation4], 128  }
 0x294   :  { %578 = vsyncadd [#allocation4], 4294967168 }
 0x295   :  { %373 = vsyncpa [#allocation3], 1 }
 0x296   :  { %374 = vsyncpa [#allocation6], 1 }
 0x297   :  { %375 = vsyncpa [#allocation4], 1 }

</bundles_post_ra>
